<compile_context>
chip_gen: v7x
topology: tpu7x:2x2x1
jax: 0.10.0
libtpu: 0.0.40
codegen_flags: <defaults>
</compile_context>

<pallas_src>
import functools

import jax
import jax.numpy as jnp
from jax.experimental import pallas as pl
from jax.experimental.pallas import tpu as pltpu


def _round_up(n, m):
    return ((n + m - 1) // m) * m


def classblock_kernel(x_ref, w1_ref, shift_ref, w2_ref, b2_ref,
                      logits_ref, f_ref, *, approx_recip):
    # x_ref: [tb, D] in its original dtype (f32); cast to the matmul dtype here (VPU,
    # free slot) so the wrapper never writes a padded/casted copy of x back to HBM.
    x = x_ref[...].astype(w1_ref.dtype)

    # add_block: Linear with eval-mode BatchNorm1d folded into the weight/shift.
    h = jnp.dot(x, w1_ref[...], preferred_element_type=jnp.float32) + shift_ref[...]

    # f = h / (||h||_2 + 1e-8).  Padded columns of w1/shift are zero, so padded columns
    # of h are exactly zero and the row norm over the padded width equals the true norm.
    sq = jnp.sum(h * h, axis=1, keepdims=True)                  # [tb, 1]
    inv = pl.reciprocal(jnp.sqrt(sq) + 1e-8, approx=approx_recip)
    f_ref[...] = (h * inv).astype(f_ref.dtype)

    # classifier: Dropout is identity in eval, then Linear.
    logits = jnp.dot(h.astype(w2_ref.dtype), w2_ref[...],
                     preferred_element_type=jnp.float32) + b2_ref[...]
    logits_ref[...] = logits.astype(logits_ref.dtype)


def prepare_class_block_params(params, matmul_dtype=jnp.bfloat16, bn_eps=1e-5):
    """Fold BN into the first Linear, pad H/C to lane-dense multiples of 128, cast once.

    Do this once per checkpoint (hoisted out of the per-forward path).
    """
    w1, b1 = params["w1"], params["b1"]
    bn_gamma, bn_beta = params["bn_gamma"], params["bn_beta"]
    bn_mean, bn_var = params["bn_mean"], params["bn_var"]
    w2, b2 = params["w2"], params["b2"]

    D, H = w1.shape
    C = w2.shape[1]

    # h = (x @ w1 + b1) * scale + (beta - mean*scale) = x @ (w1*scale) + shift
    scale = bn_gamma / jnp.sqrt(bn_var + bn_eps)
    w1_f = w1 * scale[None, :]
    shift = b1 * scale + bn_beta - bn_mean * scale

    Hp = _round_up(H, 128)
    Cp = _round_up(C, 128)
    w1_p = jnp.pad(w1_f, ((0, 0), (0, Hp - H))).astype(matmul_dtype)      # [D, Hp]
    shift_p = jnp.pad(shift, (0, Hp - H)).reshape(1, Hp).astype(jnp.float32)
    w2_p = jnp.pad(w2, ((0, Hp - H), (0, Cp - C))).astype(matmul_dtype)   # [Hp, Cp]
    b2_p = jnp.pad(b2, (0, Cp - C)).reshape(1, Cp).astype(jnp.float32)

    return dict(w1=w1_p, shift=shift_p, w2=w2_p, b2=b2_p,
                dims=(D, H, C), matmul_dtype=jnp.dtype(matmul_dtype))


def class_block_forward(x, prepared, *, tile_b=256, out_dtype=None):
    """x: [B, input_dim].  Returns (logits [B, class_num], f [B, num_bottleneck]).

    Output dtype defaults to the matmul dtype (bf16 on the production path to halve
    output HBM traffic; f32 on the exact validation path).
    """
    w1_p, shift_p, w2_p, b2_p = (prepared["w1"], prepared["shift"],
                                 prepared["w2"], prepared["b2"])
    D, H, C = prepared["dims"]
    matmul_dtype = prepared["matmul_dtype"]
    Hp, Cp = w1_p.shape[1], w2_p.shape[1]

    B = x.shape[0]
    assert x.shape[1] == D

    out_dtype = jnp.dtype(matmul_dtype if out_dtype is None else out_dtype)
    approx_recip = matmul_dtype != jnp.dtype(jnp.float32)

    # Batch tile: multiple of 8 (sublane rule), >=2 grid steps whenever the batch allows
    # (v7x megacore), last tile may overhang (OOB reads unused, OOB writes dropped).
    B8 = _round_up(max(B, 1), 8)
    tb = max(8, (min(tile_b, B8) // 8) * 8)
    tb = min(tb, max(8, _round_up(pl.cdiv(B8, 2), 8)))
    grid = (pl.cdiv(B, tb),)

    # Scoped-VMEM hint: double-buffered x/out tiles + resident weights, with headroom.
    est = (2 * tb * D * jnp.dtype(x.dtype).itemsize
           + 2 * (D * Hp + Hp * Cp) * matmul_dtype.itemsize
           + 2 * (Hp + Cp) * 4
           + 2 * tb * (Hp + Cp) * out_dtype.itemsize)
    vmem_limit = int(min(64 << 20, max(32 << 20, 2 * est)))

    logits_p, f_p = pl.pallas_call(
        functools.partial(classblock_kernel, approx_recip=approx_recip),
        out_shape=(
            jax.ShapeDtypeStruct((B, Cp), out_dtype),
            jax.ShapeDtypeStruct((B, Hp), out_dtype),
        ),
        grid=grid,
        in_specs=[
            pl.BlockSpec((tb, D), lambda i: (i, 0)),    # x      (streamed, original dtype)
            pl.BlockSpec((D, Hp), lambda i: (0, 0)),    # w1'    (VMEM-resident)
            pl.BlockSpec((1, Hp), lambda i: (0, 0)),    # shift' (VMEM-resident)
            pl.BlockSpec((Hp, Cp), lambda i: (0, 0)),   # w2     (VMEM-resident)
            pl.BlockSpec((1, Cp), lambda i: (0, 0)),    # b2     (VMEM-resident)
        ],
        out_specs=(
            pl.BlockSpec((tb, Cp), lambda i: (i, 0)),   # logits (lane-dense Cp)
            pl.BlockSpec((tb, Hp), lambda i: (i, 0)),   # f      (lane-dense Hp)
        ),
        compiler_params=pltpu.CompilerParams(
            dimension_semantics=("parallel",),
            vmem_limit_bytes=vmem_limit,
        ),
    )(x, w1_p, shift_p, w2_p, b2_p)

    return logits_p[:, :C], f_p[:, :H]


def class_block_apply(x, params, *, matmul_dtype=jnp.bfloat16, tile_b=256, out_dtype=None):
    """One-shot convenience: fold/pad params then run (prefer prepare_* once for repeated calls)."""
    prepared = prepare_class_block_params(params, matmul_dtype=matmul_dtype)
    return class_block_forward(x, prepared, tile_b=tile_b, out_dtype=out_dtype)


def init_params(key, input_dim, class_num, num_bottleneck):
    """Deterministic synthetic init mirroring weights_init_kaiming / weights_init_classifier."""
    k1, k2, k3 = jax.random.split(key, 3)
    # Linear(input_dim, num_bottleneck): kaiming_normal, mode='fan_out' on [out, in]
    # -> std = sqrt(2 / out_features).  Stored transposed as [in, out].
    std1 = (2.0 / num_bottleneck) ** 0.5
    w1 = std1 * jax.random.normal(k1, (input_dim, num_bottleneck), jnp.float32)
    b1 = jnp.zeros((num_bottleneck,), jnp.float32)
    # BatchNorm1d: weight ~ N(1, 0.02), bias = 0, running stats at init.
    bn_gamma = 1.0 + 0.02 * jax.random.normal(k2, (num_bottleneck,), jnp.float32)
    bn_beta = jnp.zeros((num_bottleneck,), jnp.float32)
    bn_mean = jnp.zeros((num_bottleneck,), jnp.float32)
    bn_var = jnp.ones((num_bottleneck,), jnp.float32)
    # classifier Linear(num_bottleneck, class_num): normal(std=0.001), bias = 0.
    w2 = 0.001 * jax.random.normal(k3, (num_bottleneck, class_num), jnp.float32)
    b2 = jnp.zeros((class_num,), jnp.float32)
    return dict(w1=w1, b1=b1, bn_gamma=bn_gamma, bn_beta=bn_beta,
                bn_mean=bn_mean, bn_var=bn_var, w2=w2, b2=b2)


if __name__ == "__main__":
    key = jax.random.PRNGKey(0)
    kx, kp = jax.random.split(key)

    # Small shapes consistent with the ClassBlock head: x is [batch, input_dim].
    B, input_dim, num_bottleneck, class_num = 8, 64, 32, 16

    x = jax.random.normal(kx, (B, input_dim), jnp.float32)
    params = init_params(kp, input_dim, class_num, num_bottleneck)

    # Reference in plain JAX (eval-mode math, f32 end-to-end).
    scale = params["bn_gamma"] / jnp.sqrt(params["bn_var"] + 1e-5)
    shift = params["bn_beta"] - params["bn_mean"] * scale
    h_ref = (x @ params["w1"] + params["b1"]) * scale + shift
    ref_f = h_ref / (jnp.linalg.norm(h_ref, axis=1, keepdims=True) + 1e-8)
    ref_logits = h_ref @ params["w2"] + params["b2"]

    # 1) Exact f32 MXU path (f32 outputs, exact reciprocal) — tight tolerance.
    prep32 = prepare_class_block_params(params, matmul_dtype=jnp.float32)
    logits32, feat32 = class_block_forward(x, prep32)
    jax.block_until_ready((logits32, feat32))
    assert logits32.shape == (B, class_num) and feat32.shape == (B, num_bottleneck)
    assert logits32.dtype == jnp.float32 and feat32.dtype == jnp.float32
    assert jnp.allclose(logits32, ref_logits, atol=1e-5, rtol=1e-5)
    assert jnp.allclose(feat32, ref_f, atol=1e-5, rtol=1e-5)

    # 2) Production bf16 path (bf16 MXU, bf16 outputs, approx reciprocal) — loose tolerance.
    prep_bf = prepare_class_block_params(params)  # bf16
    logits_bf, feat_bf = class_block_forward(x, prep_bf)
    jax.block_until_ready((logits_bf, feat_bf))
    assert logits_bf.shape == (B, class_num) and feat_bf.shape == (B, num_bottleneck)
    assert logits_bf.dtype == jnp.bfloat16 and feat_bf.dtype == jnp.bfloat16
    assert jnp.allclose(logits_bf.astype(jnp.float32), ref_logits, atol=1e-2, rtol=1e-2)
    assert jnp.allclose(feat_bf.astype(jnp.float32), ref_f, atol=1e-2, rtol=1e-2)

    print("KERNEL_OK")
</pallas_src>

<mosaic_0001>
module attributes {stable_mosaic.version = 11 : i64} {
  func.func @classblock_kernel(%arg0: i32, %arg1: memref<8x64xf32, #tpu.memory_space<vmem>>, %arg2: memref<64x128xf32, #tpu.memory_space<vmem>>, %arg3: memref<1x128xf32, #tpu.memory_space<vmem>>, %arg4: memref<128x128xf32, #tpu.memory_space<vmem>>, %arg5: memref<1x128xf32, #tpu.memory_space<vmem>>, %arg6: memref<8x128xf32, #tpu.memory_space<vmem>>, %arg7: memref<8x128xf32, #tpu.memory_space<vmem>>) attributes {dimension_semantics = [#tpu.dimension_semantics<parallel>], iteration_bounds = array<i64: 1>, scalar_prefetch = 0 : i64, scratch_operands = 0 : i64, tpu.core_type = #tpu.core_type<tc>, window_params = [{transform_indices = @transform_0, window_bounds = array<i64: 8, 64>}, {pipeline_mode = #tpu.pipeline_mode<synchronous>, transform_indices = @transform_1, window_bounds = array<i64: 64, 128>}, {pipeline_mode = #tpu.pipeline_mode<synchronous>, transform_indices = @transform_2, window_bounds = array<i64: 1, 128>}, {pipeline_mode = #tpu.pipeline_mode<synchronous>, transform_indices = @transform_3, window_bounds = array<i64: 128, 128>}, {pipeline_mode = #tpu.pipeline_mode<synchronous>, transform_indices = @transform_4, window_bounds = array<i64: 1, 128>}, {transform_indices = @transform_5, window_bounds = array<i64: 8, 128>}, {transform_indices = @transform_6, window_bounds = array<i64: 8, 128>}]} {
    %c0 = arith.constant 0 : index
    %c0_0 = arith.constant 0 : index
    %0 = vector.load %arg1[%c0, %c0_0] : memref<8x64xf32, #tpu.memory_space<vmem>>, vector<8x64xf32>
    %c0_1 = arith.constant 0 : index
    %c0_2 = arith.constant 0 : index
    %1 = vector.load %arg2[%c0_1, %c0_2] : memref<64x128xf32, #tpu.memory_space<vmem>>, vector<64x128xf32>
    %cst = arith.constant dense<0.000000e+00> : vector<8x128xf32>
    %2 = tpu.matmul %0, %1, %cst {dimension_numbers = #tpu.dot_dimension_numbers<[1], [0], [0], [1], [0, 0, 1, 1], [], []>} : vector<8x64xf32>, vector<64x128xf32>, vector<8x128xf32> -> vector<8x128xf32>
    %c0_3 = arith.constant 0 : index
    %c0_4 = arith.constant 0 : index
    %3 = vector.load %arg3[%c0_3, %c0_4] : memref<1x128xf32, #tpu.memory_space<vmem>>, vector<1x128xf32>
    %4 = vector.broadcast %3 : vector<1x128xf32> to vector<8x128xf32>
    %5 = arith.addf %2, %4 : vector<8x128xf32>
    %6 = arith.mulf %5, %5 : vector<8x128xf32>
    %cst_5 = arith.constant dense<0.000000e+00> : vector<8xf32>
    %7 = vector.multi_reduction <add>, %6, %cst_5 [1] : vector<8x128xf32> to vector<8xf32>
    %8 = vector.shape_cast %7 : vector<8xf32> to vector<8x1xf32>
    %9 = math.sqrt %8 : vector<8x1xf32>
    %cst_6 = arith.constant 9.99999993E-9 : f32
    %10 = vector.broadcast %cst_6 : f32 to vector<8x1xf32>
    %11 = arith.addf %9, %10 : vector<8x1xf32>
    %12 = tpu.reciprocal %11 : vector<8x1xf32> -> vector<8x1xf32>
    %13 = vector.broadcast %12 : vector<8x1xf32> to vector<8x128xf32>
    %14 = arith.mulf %5, %13 : vector<8x128xf32>
    %c0_7 = arith.constant 0 : index
    %c0_8 = arith.constant 0 : index
    %15 = vector.load %arg7[%c0_7, %c0_8] : memref<8x128xf32, #tpu.memory_space<vmem>>, vector<8x128xf32>
    tpu.vector_store %arg7[%c0_7, %c0_8], %14 {strides = array<i32>} : memref<8x128xf32, #tpu.memory_space<vmem>>, vector<8x128xf32>,
    %c0_9 = arith.constant 0 : index
    %c0_10 = arith.constant 0 : index
    %16 = vector.load %arg4[%c0_9, %c0_10] : memref<128x128xf32, #tpu.memory_space<vmem>>, vector<128x128xf32>
    %cst_11 = arith.constant dense<0.000000e+00> : vector<8x128xf32>
    %17 = tpu.matmul %5, %16, %cst_11 {dimension_numbers = #tpu.dot_dimension_numbers<[1], [0], [0], [1], [0, 0, 1, 1], [], []>} : vector<8x128xf32>, vector<128x128xf32>, vector<8x128xf32> -> vector<8x128xf32>
    %c0_12 = arith.constant 0 : index
    %c0_13 = arith.constant 0 : index
    %18 = vector.load %arg5[%c0_12, %c0_13] : memref<1x128xf32, #tpu.memory_space<vmem>>, vector<1x128xf32>
    %19 = vector.broadcast %18 : vector<1x128xf32> to vector<8x128xf32>
    %20 = arith.addf %17, %19 : vector<8x128xf32>
    %c0_14 = arith.constant 0 : index
    %c0_15 = arith.constant 0 : index
    %21 = vector.load %arg6[%c0_14, %c0_15] : memref<8x128xf32, #tpu.memory_space<vmem>>, vector<8x128xf32>
    tpu.vector_store %arg6[%c0_14, %c0_15], %20 {strides = array<i32>} : memref<8x128xf32, #tpu.memory_space<vmem>>, vector<8x128xf32>,
    return
  }
  func.func @transform_0(%arg0: i32) -> (i32, i32) {
    %c0_i32 = arith.constant 0 : i32
    %c0_i32_0 = arith.constant 0 : i32
    return %arg0, %c0_i32 : i32, i32
  }
  func.func @transform_1(%arg0: i32) -> (i32, i32) {
    %c0_i32 = arith.constant 0 : i32
    %c0_i32_0 = arith.constant 0 : i32
    %c0_i32_1 = arith.constant 0 : i32
    return %c0_i32, %c0_i32_0 : i32, i32
  }
  func.func @transform_2(%arg0: i32) -> (i32, i32) {
    %c0_i32 = arith.constant 0 : i32
    %c0_i32_0 = arith.constant 0 : i32
    %c0_i32_1 = arith.constant 0 : i32
    return %c0_i32, %c0_i32_0 : i32, i32
  }
  func.func @transform_3(%arg0: i32) -> (i32, i32) {
    %c0_i32 = arith.constant 0 : i32
    %c0_i32_0 = arith.constant 0 : i32
    %c0_i32_1 = arith.constant 0 : i32
    return %c0_i32, %c0_i32_0 : i32, i32
  }
  func.func @transform_4(%arg0: i32) -> (i32, i32) {
    %c0_i32 = arith.constant 0 : i32
    %c0_i32_0 = arith.constant 0 : i32
    %c0_i32_1 = arith.constant 0 : i32
    return %c0_i32, %c0_i32_0 : i32, i32
  }
  func.func @transform_5(%arg0: i32) -> (i32, i32) {
    %c0_i32 = arith.constant 0 : i32
    %c0_i32_0 = arith.constant 0 : i32
    return %arg0, %c0_i32 : i32, i32
  }
  func.func @transform_6(%arg0: i32) -> (i32, i32) {
    %c0_i32 = arith.constant 0 : i32
    %c0_i32_0 = arith.constant 0 : i32
    return %arg0, %c0_i32 : i32, i32
  }
}

</mosaic_0001>

<bundles_post_ra>
// kernel: tpu_custom_call.1
= control target key start
LH: loop header
LB: loop body
LE: loop exit
PB: predicated region body
PF: predicated region fallthrough
CT: control target
= control target key end

     0   :  { %12 = vsyncpa [#allocation3], 0  ;;  %s659_s0 = inlined_call_operand.hbm [shape: f32[8,64], index: 0, kind: input, shape index: {}]   ;;  %s660_s1 = inlined_call_operand.hbm [shape: f32[64,128], index: 1, kind: input, shape index: {}]   ;;  %s661_s2 = inlined_call_operand.vmem [shape: f32[1,128], index: 2, kind: input, shape index: {}]   ;;  %s662_s3 = inlined_call_operand.hbm [shape: f32[128,128], index: 3, kind: input, shape index: {}]   ;;  %s663_s4 = inlined_call_operand.vmem [shape: f32[1,128], index: 4, kind: input, shape index: {}]   ;;  %s664_s5 = inlined_call_operand.hbm [shape: f32[8,128], index: 5, kind: output, shape index: {0}]   ;;  %s665_s6 = inlined_call_operand.hbm [shape: f32[8,128], index: 6, kind: output, shape index: {1}]  }
   0x1   :  { %13 = vsyncpa [#allocation6], 0 }
   0x2   :  { %14 = vsyncpa [#allocation4], 0 }
   0x3   :  { %15 = vsyncpa [#allocation10], 0  ;;  %s542_s21 = smov [#allocation5]   ;;  %s424_s25 = scalar_lea.hbm %s660_s1, 1024 }
   0x4   :  { %s31_s22 = sshll.u32 %s542_s21, 4  ;;  %p425_p0 = scmp.ne.s32.totalorder %s660_s1, %s424_s25  ;;  %s32_s22 = int_to_ptr.vmem [resolvable:$true] %s31_s22 }
   0x5   :  { %p428_p1 = scmp.lt.u32.totalorder %s424_s25, %s660_s1 }
   0x7   :  { %p430_p2 = pnand %p428_p1, %p425_p0 }
   0x9   :  { %433 = shalt.err (!%p430_p2)
}
   0xa   :  { %s434_s30 = scalar_lea.vmem %s32_s22, 1024  ;;  %p439_p4 = scmp.lt.s32.totalorder %s32_s22, %s32_s22 }
   0xb   :  { %p435_p3 = scmp.ne.s32.totalorder %s32_s22, %s434_s30  ;;  %p440_p5 = scmp.lt.s32.totalorder %s434_s30, %s434_s30 }
   0xd   :  { %p441_p6 = por %p440_p5, %p439_p4 }
   0xf   :  { %p442_p7 = pnand %p441_p6, %p435_p3 }
  0x11   :  { %445 = shalt.err (!%p442_p7)
}
  0x12   :  { %s543_s7 = smov 128   ;;  %s544_s8 = smov 8  }
  0x13   :  { %37 = dma.hbm_to_vmem [thread:$0]  %s660_s1, 1024, %s32_s22, [#allocation6], %s543_s7, %s543_s7, %s544_s8  }
  0x14   :  { %s545_s11 = smov [#allocation2]   ;;  %s546_s13 = smov [#allocation7]  }
  0x15   :  { %s22_s12 = sshll.u32 %s545_s11, 4  ;;  %s45_s14 = sshll.u32 %s546_s13, 4  ;;  %s23_s12 = int_to_ptr.vmem [resolvable:$true] %s22_s12  ;;  %s46_s14 = int_to_ptr.vmem [resolvable:$true] %s45_s14 }
  0x16   :  { %s446_s17 = scalar_lea.hbm %s659_s0, 128 }
  0x17   :  { %p447_p8 = scmp.ne.s32.totalorder %s659_s0, %s446_s17  ;;  %p450_p9 = scmp.lt.u32.totalorder %s446_s17, %s659_s0 }
  0x19   :  { %p452_p10 = pnand %p450_p9, %p447_p8 }
  0x1b   :  { %455 = shalt.err (!%p452_p10)
}
  0x1c   :  { %s456_s1 = scalar_lea.vmem %s23_s12, 128  ;;  %p461_p12 = scmp.lt.s32.totalorder %s23_s12, %s23_s12 }
  0x1d   :  { %p457_p11 = scmp.ne.s32.totalorder %s23_s12, %s456_s1  ;;  %p462_p13 = scmp.lt.s32.totalorder %s456_s1, %s456_s1 }
  0x1f   :  { %p463_p0 = por %p462_p13, %p461_p12 }
  0x21   :  { %p464_p1 = pnand %p463_p0, %p457_p11 }
  0x23   :  { %467 = shalt.err (!%p464_p1)
}
  0x24   :  { %25 = dma.hbm_to_vmem [thread:$0]  %s659_s0, 128, %s23_s12, [#allocation3]  }
  0x25   :  { %s468_s26 = scalar_lea.hbm %s662_s3, 2048 }
  0x26   :  { %p469_p2 = scmp.ne.s32.totalorder %s662_s3, %s468_s26  ;;  %p472_p3 = scmp.lt.u32.totalorder %s468_s26, %s662_s3 }
  0x28   :  { %p474_p4 = pnand %p472_p3, %p469_p2 }
  0x2a   :  { %477 = shalt.err (!%p474_p4)
}
  0x2b   :  { %s478_s9 = scalar_lea.vmem %s46_s14, 2048  ;;  %p483_p6 = scmp.lt.s32.totalorder %s46_s14, %s46_s14 }
  0x2c   :  { %p479_p5 = scmp.ne.s32.totalorder %s46_s14, %s478_s9  ;;  %p484_p7 = scmp.lt.s32.totalorder %s478_s9, %s478_s9 }
  0x2e   :  { %p485_p8 = por %p484_p7, %p483_p6 }
  0x30   :  { %p486_p9 = pnand %p485_p8, %p479_p5 }
  0x32   :  { %489 = shalt.err (!%p486_p9)
}
  0x33   :  { %51 = dma.hbm_to_vmem [thread:$0]  %s662_s3, 2048, %s46_s14, [#allocation6], %s543_s7, %s543_s7, %s544_s8  }
  0x34   :  { %534 = dma.done.wait [#allocation3], 128  }
  0x35   :  { %535 = vsyncadd [#allocation3], 4294967168 }
  0x36   :  { %536 = dma.done.wait [#allocation6], 3072  }
  0x37   :  { %537 = vsyncadd [#allocation6], 4294964224  ;;  %v547_v0 = vmov 0.0|0.0   ;;  %vm548_vm0 = vmmov 0   ;;  %v549_v1 = vmov 0.0   ;;  %v64_v2 = vld [vmem:[#allocation5] sm:$0xff] }
  0x38   :  { %374 = vmatprep.subr.bf16.mxu0 %v547_v0  ;;  %336 = vmatprep.mubr.msk.f32.mxu0 %vm548_vm0, %v549_v1  ;;  %v65_v3 = vld [vmem:[#allocation5 + $0x8] sm:$0xff]  ;;  %v66_v4 = vld [vmem:[#allocation5 + $0x10] sm:$0xff]  ;;  %v67_v6 = vld [vmem:[#allocation5 + $0x18] sm:$0xff]  ;;  %vm79_vm1 = vcmask 523264   ;;  %s550_s8 = smov [#allocation9]  }
  0x39   :  { %386 = vmatprep.subr.bf16.mxu1 %v547_v0  ;;  %371 = vmatprep.mubr.msk.f32.mxu1 %vm548_vm0, %v549_v1  ;;  %v375_v5 = vpack.c.bf16 %v65_v3, %v64_v2  ;;  %v378_v7 = vpack.c.bf16 %v67_v6, %v66_v4  ;;  %v167_v8 = vld [vmem:[#allocation7] sm:$0xff]  ;;  %v168_v9 = vld [vmem:[#allocation7 + $0x8] sm:$0xff]  ;;  %v169_v10 = vld [vmem:[#allocation7 + $0x10] sm:$0xff]  ;;  %s277_s11 = sshll.u32 %s550_s8, 4  ;;  %s278_s11 = int_to_ptr.vmem [resolvable:$true] %s277_s11 }
  0x3a   :  { %v68_v11 = vld [vmem:[#allocation5 + $0x20] sm:$0xff]  ;;  %v69_v12 = vld [vmem:[#allocation5 + $0x28] sm:$0xff]  ;;  %v387_v13 = vpack.c.bf16 %v168_v9, %v167_v8  ;;  %v170_v14 = vld [vmem:[#allocation7 + $0x18] sm:$0xff]  ;;  %p495_p11 = scmp.lt.s32.totalorder %s278_s11, %s278_s11 }
  0x3b   :  { %376 = vmatpush3.bf16.msra.mxu0 %v375_v5  ;;  %v390_v15 = vpack.c.bf16 %v170_v14, %v169_v10  ;;  %v381_v16 = vpack.c.bf16 %v69_v12, %v68_v11  ;;  %v171_v17 = vld [vmem:[#allocation7 + $0x20] sm:$0xff]  ;;  %v172_v18 = vld [vmem:[#allocation7 + $0x28] sm:$0xff]  ;;  %v70_v19 = vld [vmem:[#allocation5 + $0x30] sm:$0xff] }
  0x3c   :  { %377 = vmatprep.subr.bf16.mxu0 %v547_v0  ;;  %388 = vmatpush3.bf16.msra.mxu1 %v387_v13  ;;  %v71_v20 = vld [vmem:[#allocation5 + $0x38] sm:$0xff]  ;;  %v393_v21 = vpack.c.bf16 %v172_v18, %v171_v17  ;;  %v173_v23 = vld [vmem:[#allocation7 + $0x30] sm:$0xff]  ;;  %v175_v27 = vld [vmem:[#allocation7 + $0x40] sm:$0xff] }
  0x3d   :  { %389 = vmatprep.subr.bf16.mxu1 %v547_v0  ;;  %v384_v22 = vpack.c.bf16 %v71_v20, %v70_v19  ;;  %v174_v24 = vld [vmem:[#allocation7 + $0x38] sm:$0xff]  ;;  %v176_v28 = vld [vmem:[#allocation7 + $0x48] sm:$0xff]  ;;  %v177_v30 = vld [vmem:[#allocation7 + $0x50] sm:$0xff] }
  0x3e   :  { %v396_v25 = vpack.c.bf16 %v174_v24, %v173_v23  ;;  %v63_v26 = vld [vmem:[#allocation2] sm:$0xff]  ;;  %v399_v29 = vpack.c.bf16 %v176_v28, %v175_v27  ;;  %v179_v33 = vld [vmem:[#allocation7 + $0x60] sm:$0xff]  ;;  %v180_v34 = vld [vmem:[#allocation7 + $0x68] sm:$0xff] }
  0x3f   :  { %379 = vmatpush3.bf16.msra.mxu0 %v378_v7  ;;  %v178_v31 = vld [vmem:[#allocation7 + $0x58] sm:$0xff]  ;;  %v405_v35 = vpack.c.bf16 %v180_v34, %v179_v33  ;;  %v181_v36 = vld [vmem:[#allocation7 + $0x70] sm:$0xff] }
  0x40   :  { %380 = vmatprep.subr.bf16.mxu0 %v547_v0  ;;  %391 = vmatpush3.bf16.msra.mxu1 %v390_v15  ;;  %v402_v32 = vpack.c.bf16 %v178_v31, %v177_v30  ;;  %v182_v37 = vld [vmem:[#allocation7 + $0x78] sm:$0xff] }
  0x41   :  { %392 = vmatprep.subr.bf16.mxu1 %v547_v0  ;;  %v408_v38 = vpack.c.bf16 %v182_v37, %v181_v36  ;;  %v291_v39 = vld [vmem:[%s661_s2] ss:$0 sm:$0xff]  ;;  %s490_s2 = scalar_lea.vmem %s278_s11, 128 }
  0x42   :  { %p491_p10 = scmp.ne.s32.totalorder %s278_s11, %s490_s2  ;;  %p496_p12 = scmp.lt.s32.totalorder %s490_s2, %s490_s2 }
  0x43   :  { %382 = vmatpush3.bf16.msra.mxu0 %v381_v16 }
  0x44   :  { %383 = vmatprep.subr.bf16.mxu0 %v547_v0  ;;  %394 = vmatpush3.bf16.msra.mxu1 %v393_v21  ;;  %p497_p13 = por %p496_p12, %p495_p11 }
  0x45   :  { %395 = vmatprep.subr.bf16.mxu1 %v547_v0 }
  0x46   :  { %p498_p0 = pnand %p497_p13, %p491_p10 }
  0x47   :  { %385 = vmatpush3.bf16.msra.mxu0 %v384_v22 }
  0x48   :  { %397 = vmatpush3.bf16.msra.mxu1 %v396_v25 }
  0x49   :  { %398 = vmatprep.subr.bf16.mxu1 %v547_v0 }
  0x4a   :  { %337 = vmatmul.mubr.msk.f32.vlgmr.msra.gmra.mrb[0].mxu0 %vm79_vm1, %v63_v26 }
  0x4c   :  { %400 = vmatpush3.bf16.msra.mxu1 %v399_v29 }
  0x4d   :  { %401 = vmatprep.subr.bf16.mxu1 %v547_v0 }
  0x50   :  { %403 = vmatpush3.bf16.msra.mxu1 %v402_v32 }
  0x51   :  { %404 = vmatprep.subr.bf16.mxu1 %v547_v0 }
  0x54   :  { %406 = vmatpush3.bf16.msra.mxu1 %v405_v35 }
  0x55   :  { %407 = vmatprep.subr.bf16.mxu1 %v547_v0 }
  0x58   :  { %409 = vmatpush3.bf16.msra.mxu1 %v408_v38 }
 0x11d   :  { %v149_v40 = vpop.f32.mrb[0].mxu0 }
 0x11e   :  { %v150_v41 = vadd.f32 %v291_v39, %v149_v40  ;;  %v338_v42 = vpop.f32.mrb[1].mxu0 }
 0x120   :  { %372 = vmatmul.mubr.f32.vlgmr.msra.gmra.mrb[0].mxu1 %v150_v41  ;;  %v153_v43 = vmul.f32 %v150_v41, %v150_v41 }
 0x122   :  { %154 = vadd.xlane.f32.xlu0 %v153_v43 }
 0x1af   :  { %v155_v44 = vpop.xlane.xlu0 %154 }
 0x1b0   :  { %420 = vrsqrt.f32 %v155_v44  ;;  %vm158_vm2 = vcmp.eq.f32.partialorder %v155_v44, inf  ;;  %v161_v47 = vand.u32 2147483648, %v155_v44  ;;  %vm160_vm3 = vcmp.eq.f32.partialorder %v155_v44, 0.0 }
 0x1ba   :  { %v421_v45 = vpop.eup %420 }
 0x1bb   :  { %v157_v46 = vmul.f32 %v421_v45, %v155_v44 }
 0x1bd   :  { %v159_v48 = vsel %vm158_vm2, %v155_v44, %v157_v46 }
 0x1be   :  { %v162_v49 = vsel %vm160_vm3, %v161_v47, %v159_v48 }
 0x1bf   :  { %v163_v50 = vadd.f32 1e-08, %v162_v49 }
 0x1c1   :  { %422 = vrcp.f32 %v163_v50 }
 0x1cb   :  { %v423_v51 = vpop.eup %422 }
 0x1cc   :  { %v165_v52 = vmul.f32 %v423_v51, %v150_v41 }
 0x1ce   :  { %166 = vst [vmem:[#allocation9] sm:$0xff] %v165_v52 }
 0x1cf   :  { %501 = shalt.err (!%p498_p0)
}
 0x1d0   :  { %s502_s14 = scalar_lea.hbm %s665_s6, 128 }
 0x1d1   :  { %p503_p1 = scmp.ne.s32.totalorder %s665_s6, %s502_s14  ;;  %p506_p2 = scmp.lt.u32.totalorder %s502_s14, %s665_s6 }
 0x1d3   :  { %p508_p3 = pnand %p506_p2, %p503_p1 }
 0x1d5   :  { %511 = shalt.err (!%p508_p3)
}
 0x1d6   :  { %280 = dma.vmem_to_hbm [thread:$0]  %s278_s11, 128, %s665_s6, [#allocation10]   ;;  %v293_v53 = vld [vmem:[%s663_s4] ss:$0 sm:$0xff] }
 0x1d7   :  { %s551_s22 = smov [#allocation8]  }
 0x1d8   :  { %s267_s23 = sshll.u32 %s551_s22, 4  ;;  %s268_s23 = int_to_ptr.vmem [resolvable:$true] %s267_s23 }
 0x1d9   :  { %s512_s24 = scalar_lea.vmem %s268_s23, 128  ;;  %p517_p5 = scmp.lt.s32.totalorder %s268_s23, %s268_s23 }
 0x1da   :  { %p513_p4 = scmp.ne.s32.totalorder %s268_s23, %s512_s24  ;;  %p518_p6 = scmp.lt.s32.totalorder %s512_s24, %s512_s24 }
 0x1dc   :  { %p519_p7 = por %p518_p6, %p517_p5 }
 0x1de   :  { %p520_p8 = pnand %p519_p7, %p513_p4 }
 0x1f3   :  { %v256_v54 = vpop.f32.mrb[0].mxu1 }
 0x1f4   :  { %v257_v55 = vadd.f32 %v293_v53, %v256_v54  ;;  %v373_v56 = vpop.f32.mrb[1].mxu1 }
 0x1f6   :  { %260 = vst [vmem:[#allocation8] sm:$0xff] %v257_v55 }
 0x1f7   :  { %523 = shalt.err (!%p520_p8)
}
 0x1f8   :  { %s524_s26 = scalar_lea.hbm %s664_s5, 128 }
 0x1f9   :  { %p525_p9 = scmp.ne.s32.totalorder %s664_s5, %s524_s26  ;;  %p528_p10 = scmp.lt.u32.totalorder %s524_s26, %s664_s5 }
 0x1fb   :  { %p530_p11 = pnand %p528_p10, %p525_p9 }
 0x1fd   :  { %533 = shalt.err (!%p530_p11)
}
 0x1fe   :  { %270 = dma.vmem_to_hbm [thread:$0]  %s268_s23, 128, %s664_s5, [#allocation4]  }
 0x1ff   :  { %538 = dma.done.wait [#allocation4], 128  }
 0x200   :  { %539 = vsyncadd [#allocation4], 4294967168 }
 0x201   :  { %540 = dma.done.wait [#allocation10], 128  }
 0x202   :  { %541 = vsyncadd [#allocation10], 4294967168 }
 0x203   :  { %287 = vsyncpa [#allocation3], 1 }
 0x204   :  { %288 = vsyncpa [#allocation6], 1 }
 0x205   :  { %289 = vsyncpa [#allocation4], 1 }
 0x206   :  { %290 = vsyncpa [#allocation10], 1 }

</bundles_post_ra>
